<compile_context>
chip_gen: v6e
topology: v6e:2x2x1
jax: 0.10.0
libtpu: 0.0.40
codegen_flags: <defaults>
</compile_context>

<pallas_src>
import jax
import jax.numpy as jnp
from jax.experimental import pallas as pl
from jax.experimental.pallas import tpu as pltpu


_MIN_SUBLANES = {4: 8, 2: 16, 1: 32}  # packed-sublane minimum per dtype width


def _mfm_kernel(x_ref, o_ref):
    # x_ref: (2, tr, tl) -- both channel halves of this tile; o_ref: (tr, tl).
    o_ref[...] = jnp.maximum(x_ref[0], x_ref[1])


def _pick_row_tile(n_rows, lane, itemsize, n_batch):
    """Row-tile size: a multiple of the packed-sublane minimum (or the full
    extent), grown until the output block reaches ~4 MiB."""
    min_sub = _MIN_SUBLANES.get(itemsize, 8)
    budget = 4 * 1024 * 1024                      # target output-block bytes
    max_rows = max(min_sub, budget // (lane * itemsize))
    if n_rows <= max_rows:
        tr = n_rows                               # full extent: always legal
    else:
        tr = max(min_sub, (max_rows // min_sub) * min_sub)
        # Prefer a tile that divides n_rows evenly (no ragged, masked tail).
        cand = tr
        while cand >= min_sub and n_rows % cand != 0:
            cand -= min_sub
        if cand >= min_sub:
            tr = cand
    # v7x has two TensorCores: keep >= 2 parallel grid blocks when possible.
    if n_batch == 1 and tr == n_rows and n_rows >= 2 * min_sub:
        tr = ((n_rows // 2 + min_sub - 1) // min_sub) * min_sub
    return tr


def max_feature_map_2d(x):
    """Max-Feature-Map over the channel dim (dim=1) of an NCHW tensor."""
    B, C, H, W = x.shape
    assert C % 2 == 0, "MaxFeatureMap2D requires an even channel count"
    c_half = C // 2
    hw = H * W
    n = c_half * hw                               # elements per (batch, half)
    itemsize = jnp.dtype(x.dtype).itemsize

    # Lane-dense slab layout whenever possible; otherwise fall back to
    # (c_half, hw) with full-extent (layout-legal) blocks.
    if n % 128 == 0:
        rows, lanes = n // 128, 128
    else:
        rows, lanes = c_half, hw

    x_r = x.reshape(B, 2, rows, lanes)            # metadata-only reshape

    tr = _pick_row_tile(rows, lanes, itemsize, B)
    grid = (B, pl.cdiv(rows, tr))

    # Live VMEM with the default 2-deep pipeline:
    #   2 x (2, tr, lanes) input buffers + 2 x (tr, lanes) output buffers.
    # Size the scoped-VMEM limit from the actual block (v5e's default is only
    # 16 MiB) and leave headroom; cap below every generation's physical VMEM.
    live_bytes = 6 * tr * lanes * itemsize
    vmem_limit = min(max(live_bytes + (8 << 20), 32 << 20), 100 << 20)

    out2d = pl.pallas_call(
        _mfm_kernel,
        out_shape=jax.ShapeDtypeStruct((B, rows, lanes), x.dtype),
        grid_spec=pltpu.PrefetchScalarGridSpec(
            num_scalar_prefetch=0,
            grid=grid,
            in_specs=[
                # One stream carrying both channel halves: one DMA per step.
                pl.BlockSpec((None, 2, tr, lanes), lambda b, r: (b, 0, r, 0)),
            ],
            out_specs=pl.BlockSpec((None, tr, lanes), lambda b, r: (b, r, 0)),
        ),
        compiler_params=pltpu.CompilerParams(
            dimension_semantics=("parallel", "parallel"),
            vmem_limit_bytes=vmem_limit,
        ),
    )(x_r)

    # Metadata-only reshape back to NCHW.
    return out2d.reshape(B, c_half, H, W)


def max_feature_map_2d_ref(x):
    """Pure-JAX reference matching torch .view(B, 2, C//2, H, W).max(1)."""
    B, C, H, W = x.shape
    return jnp.max(x.reshape(B, 2, C // 2, H, W), axis=1)


if __name__ == "__main__":
    key = jax.random.PRNGKey(0)

    cases = [
        (2, 4, 16, 16),   # early LCNN layer: c_half=2 -> lane-dense slab path
        (2, 32, 32, 32),  # larger channels, single full-extent block per batch
        (1, 8, 32, 32),   # batch=1 -> rows split so both v7x TCs get work
        (2, 6, 5, 9),     # hw % 128 != 0 -> fallback (c_half, hw) layout
    ]
    for i, (B, C, H, W) in enumerate(cases):
        k = jax.random.fold_in(key, i)
        x = jax.random.normal(k, (B, C, H, W), dtype=jnp.float32)
        out = jax.block_until_ready(max_feature_map_2d(x))
        ref = max_feature_map_2d_ref(x)
        assert out.shape == (B, C // 2, H, W), (out.shape, (B, C, H, W))
        assert out.dtype == x.dtype
        assert jnp.array_equal(out, ref), f"MFM mismatch for shape {(B, C, H, W)}"

    print("KERNEL_OK")
</pallas_src>

<mosaic_0001>
module attributes {stable_mosaic.version = 11 : i64} {
  func.func @_mfm_kernel(%arg0: i32, %arg1: i32, %arg2: memref<1x2x4x128xf32, #tpu.memory_space<vmem>>, %arg3: memref<1x4x128xf32, #tpu.memory_space<vmem>>) attributes {dimension_semantics = [#tpu.dimension_semantics<parallel>, #tpu.dimension_semantics<parallel>], iteration_bounds = array<i64: 2, 1>, scalar_prefetch = 0 : i64, scratch_operands = 0 : i64, tpu.core_type = #tpu.core_type<tc>, window_params = [{transform_indices = @transform_0, window_bounds = array<i64: 1, 2, 4, 128>}, {transform_indices = @transform_1, window_bounds = array<i64: 1, 4, 128>}]} {
    %c0 = arith.constant 0 : index
    %c0_0 = arith.constant 0 : index
    %c0_1 = arith.constant 0 : index
    %c0_2 = arith.constant 0 : index
    %0 = vector.load %arg2[%c0, %c0_0, %c0_1, %c0_2] : memref<1x2x4x128xf32, #tpu.memory_space<vmem>>, vector<1x1x4x128xf32>
    %1 = vector.shape_cast %0 : vector<1x1x4x128xf32> to vector<4x128xf32>
    %c0_3 = arith.constant 0 : index
    %c1 = arith.constant 1 : index
    %c0_4 = arith.constant 0 : index
    %c0_5 = arith.constant 0 : index
    %2 = vector.load %arg2[%c0_3, %c1, %c0_4, %c0_5] : memref<1x2x4x128xf32, #tpu.memory_space<vmem>>, vector<1x1x4x128xf32>
    %3 = vector.shape_cast %2 : vector<1x1x4x128xf32> to vector<4x128xf32>
    %4 = arith.maximumf %1, %3 : vector<4x128xf32>
    %c0_6 = arith.constant 0 : index
    %c0_7 = arith.constant 0 : index
    %c0_8 = arith.constant 0 : index
    %5 = vector.load %arg3[%c0_6, %c0_7, %c0_8] : memref<1x4x128xf32, #tpu.memory_space<vmem>>, vector<1x4x128xf32>
    %6 = vector.shape_cast %5 : vector<1x4x128xf32> to vector<4x128xf32>
    %7 = vector.shape_cast %4 : vector<4x128xf32> to vector<1x4x128xf32>
    tpu.vector_store %arg3[%c0_6, %c0_7, %c0_8], %7 {strides = array<i32>} : memref<1x4x128xf32, #tpu.memory_space<vmem>>, vector<1x4x128xf32>,
    return
  }
  func.func @transform_0(%arg0: i32, %arg1: i32) -> (i32, i32, i32, i32) {
    %c0_i32 = arith.constant 0 : i32
    %c0_i32_0 = arith.constant 0 : i32
    %c0_i32_1 = arith.constant 0 : i32
    return %arg0, %c0_i32, %arg1, %c0_i32_0 : i32, i32, i32, i32
  }
  func.func @transform_1(%arg0: i32, %arg1: i32) -> (i32, i32, i32) {
    %c0_i32 = arith.constant 0 : i32
    %c0_i32_0 = arith.constant 0 : i32
    return %arg0, %arg1, %c0_i32 : i32, i32, i32
  }
}

</mosaic_0001>

<bundles_post_ra>
// kernel: tpu_custom_call.1
= control target key start
LH: loop header
LB: loop body
LE: loop exit
PB: predicated region body
PF: predicated region fallthrough
CT: control target
= control target key end

     0   :  { %6 = vsyncpa [#allocation3], 0  ;;  %s590_s0 = inlined_call_operand.hbm [shape: f32[2,2,4,128], index: 0, kind: input, shape index: {}]   ;;  %s591_s1 = inlined_call_operand.hbm [shape: f32[2,4,128], index: 1, kind: output, shape index: {}]  }
   0x1   :  { %8 = vsyncpa [#allocation3 + $0x1], 0 }
   0x2   :  { %9 = vsyncpa [#allocation4], 0 }
   0x3   :  { %11 = vsyncpa [#allocation4 + $0x1], 0  ;;  %s457_s6 = smov 0   ;;  %s459_s7 = smov 0  }
   0x4   :  { %s461_s8 = smov 0   ;;  %s463_s9 = smov 0  }
   0x5   :  { %s465_s10 = smov 0   ;;  %s467_s11 = smov 0  }
   0x6 LB: > { %s253_s12 = sadd.s32 4294967295, %s441_s11   ;;  %s254_s13 = sadd.s32 4294967294, %s441_s11   ;;  %s441_s11 = sphi %s467_s11, %s17_s11   ;;  %s437_s10 = sphi %s465_s10, %s602_s10   ;;  %s433_s9 = sphi %s463_s9, %s601_s9   ;;  %s429_s8 = sphi %s461_s8, %s600_s8   ;;  %s425_s7 = sphi %s459_s7, %s599_s7   ;;  %s421_s6 = sphi %s457_s6, %s598_s6  }
   0x7   : > { %s29_s14 = sadd.s32 1, %s437_s10  ;;  %s38_s15 = sadd.s32 1, %s429_s8 }
   0x8   : > { %p31_p0 = scmp.ge.s32.totalorder %s29_s14, 2  ;;  %p45_p1 = scmp.ne.s32.totalorder %s429_s8, %s425_s7 }
   0x9   : > { %p46_p2 = scmp.eq.s32.totalorder %s441_s11, 0  ;;  %p51_p3 = scmp.ne.s32.totalorder %s425_s7, %s421_s6 }
   0xa   : > { %s604_s14 = smov (%p31_p0, %s29_s14), 0  ;;  %p52_p5 = scmp.eq.s32.totalorder %s253_s12, 0 }
   0xb   : > { %p498_p4 = por %p46_p2, %p45_p1  ;;  %s33_s17 = ssub.s32 %s437_s10, %s604_s14 }
   0xc   : > { %p77_p6 = scmp.eq.s32.totalorder %s253_s12, 1  ;;  %p36_p7 = scmp.eq.s32.totalorder %s33_s17, 0 }
   0xd   : > { %p504_p8 = por %p52_p5, %p51_p3  ;;  %p83_p10 = scmp.eq.s32.totalorder %s254_s13, 1 }
   0xe   : > { %p508_p9 = por %p77_p6, %p45_p1  ;;  %p281_p13 = scmp.lt.s32.totalorder %s441_s11, 2 }
   0xf   : > { %s513_s20 = scalar_select %p36_p7, %s429_s8, %s38_s15  }
  0x10   : > { %p515_p11 = por %p83_p10, %p51_p3  ;;  %s103_s22 = sand.u32 1, %s429_s8  }
  0x11   : > { %s257_s23 = sshll.u32 %s103_s22, 3  ;;  %s268_s24 = sshll.u32 %s437_s10, 7 }
  0x12   : > { %s114_s27 = scalar_lea.hbm %s590_s0, %s268_s24  ;;  %s107_s28 = scalar_lea.vmem [#allocation2], %s257_s23 }
  0x13   : > { %s115_s29 = sshll.u32 %s107_s28, 4  ;;  %p528_p0 = pnand %p281_p13, %p498_p4  ;;  %s116_s29 = int_to_ptr.vmem [resolvable:$true] %s115_s29 }
  0x14   : > { %p260_p1 = scmp.ge.s32.totalorder %s441_s11, 1  ;;  %s104_s2 = scalar_lea.sflag [#allocation3], %s103_s22 }
  0x15   : > { %p335_p2 = pneg %p528_p0  ;;  %s346_s3 = scalar_lea.vmem %s116_s29, 128 }
  0x16   : > { %p347_p3 = scmp.ne.s32.totalorder %s116_s29, %s346_s3  ;;  %s443_s4 = smov [#allocation2]  }
  0x17   : > { %s351_s5 = sshll.u32 %s443_s4, 4  ;;  %s352_s5 = int_to_ptr.vmem [resolvable:$false] %s351_s5 }
  0x18   : > { %p349_p5 = pnand %p347_p3, %p335_p2  ;;  %s353_s12 = scalar_lea.vmem %s352_s5, 256 }
  0x19   : > { %p354_p7 = scmp.lt.s32.totalorder %s116_s29, %s352_s5  ;;  %p355_p10 = scmp.lt.s32.totalorder %s353_s12, %s346_s3 }
  0x1a   : > { %p350_p6 = pneg %p349_p5 }
  0x1b   : > { %p356_p12 = por %p355_p10, %p354_p7 }
  0x1d   : > { %p357_p4 = pnand %p356_p12, %p350_p6 }
  0x1f   : > { %360 = shalt.err (!%p357_p4)
}
  0x20   : > { %s444_s13 = smov 64   ;;  %s445_s15 = smov 4  }
  0x21   : > { %276 = dma.hbm_to_vmem [thread:$0]  (!%p528_p0), %s114_s27, 128, %s116_s29, %s104_s2, %s444_s13, %s444_s13, %s445_s15  }
  0x22   : > { %p123_p13 = scmp.lt.s32.totalorder %s441_s11, 3 }
  0x24   : > { %p124_p2 = pnand %p260_p1, %p123_p13 }
  0x25   : > { %s541_s16 = sand.u32 (!%p124_p2), 1, %s425_s7  }
  0x26   : > { %127 = sbr.rel (%p124_p2) target bundleno = 68 (0x44), region = 24  ;;  %s261_s17 = sshll.u32 (!%p124_p2), %s541_s16, 3 }
  0x27   : > { %s130_s22 = scalar_lea.sflag (!%p124_p2), [#allocation3], %s541_s16  ;;  %s133_s23 = scalar_lea.vmem (!%p124_p2), [#allocation2], %s261_s17 }
  0x2b   : > { %412 = dma.done.wait (%p504_p8), %s130_s22, 128  }
  0x2c   : > { %414 = vsyncadd (%p504_p8), %s130_s22, 4294967168  ;;  %s262_s24 = sshll.u32 %s541_s16, 2  ;;  %s265_s27 = sshll.u32 %s433_s9, 6  ;;  %v152_v0 = vld [vmem:[%s133_s23] sm:$0xf] }
  0x2d   : > { %s151_s25 = scalar_lea.vmem [#allocation5], %s262_s24  ;;  %v263_v1 = vld [vmem:[%s133_s23 + $0x4] sm:$0xf]  ;;  %s170_s30 = scalar_lea.hbm %s591_s1, %s265_s27 }
  0x2e   : > { %s172_s26 = sshll.u32 %s151_s25, 4  ;;  %v155_v2 = vmax.f32 %v152_v0, %v263_v1  ;;  %s158_s2 = scalar_lea.sflag [#allocation4], %s541_s16  ;;  %s173_s26 = int_to_ptr.vmem [resolvable:$true] %s172_s26 }
  0x2f   : > { %s361_s18 = scalar_lea.vmem %s173_s26, 64  ;;  %s446_s3 = smov [#allocation5]  }
  0x30   : > { %156 = vst [vmem:[%s151_s25] sm:$0xf] %v155_v2  ;;  %p362_p8 = scmp.ne.s32.totalorder %s173_s26, %s361_s18  ;;  %s365_s4 = sshll.u32 %s446_s3, 4  ;;  %s366_s4 = int_to_ptr.vmem [resolvable:$false] %s365_s4 }
  0x31   : > { %s367_s5 = scalar_lea.vmem %s366_s4, 128  ;;  %p368_p1 = scmp.lt.s32.totalorder %s173_s26, %s366_s4 }
  0x32   : > { %p363_p12 = pnand %p362_p8, %p508_p9  ;;  %p369_p3 = scmp.lt.s32.totalorder %s367_s5, %s361_s18 }
  0x34   : > { %p364_p0 = pneg %p363_p12  ;;  %p370_p5 = por %p369_p3, %p368_p1 }
  0x36   : > { %p371_p6 = pnand %p370_p5, %p364_p0 }
  0x38   : > { %374 = shalt.err (!%p371_p6)
}
  0x39   : > { %s375_s9 = scalar_lea.hbm %s170_s30, 64  ;;  %s379_s15 = scalar_lea.hbm %s591_s1, 128 }
  0x3a   : > { %p376_p7 = scmp.ne.s32.totalorder %s170_s30, %s375_s9  ;;  %p380_p13 = scmp.lt.s32.totalorder %s170_s30, %s591_s1 }
  0x3b   : > { %p381_p2 = scmp.lt.s32.totalorder %s379_s15, %s375_s9 }
  0x3c   : > { %p377_p10 = pnand %p376_p7, %p508_p9 }
  0x3d   : > { %p382_p8 = por %p381_p2, %p380_p13 }
  0x3e   : > { %p378_p4 = pneg %p377_p10 }
  0x40   : > { %p383_p12 = pnand %p382_p8, %p378_p4 }
  0x42   : > { %386 = shalt.err (!%p383_p12)
}
  0x43   : > { %271 = dma.vmem_to_hbm [thread:$0]  (%p508_p9), %s173_s26, 64, %s170_s30, %s158_s2  }
  0x44 PF: > { %s184_s22 = sand.u32 1, %s421_s6   ;;  %p597_p0 = scmp.ge.s32.totalorder %s441_s11, 2 }
  0x45   : > { %s185_s23 = scalar_lea.sflag [#allocation4], %s184_s22 }
  0x46   : > { %p278_p1 = pnand %p597_p0, %p515_p11 }
  0x48   : > { %p279_p3 = pneg %p278_p1 }
  0x4a   : > { %416 = dma.done.wait (%p279_p3), %s185_s23, 64  }
  0x4b   : > { %418 = vsyncadd (%p279_p3), %s185_s23, 4294967232  ;;  %s17_s11 = sadd.s32 1, %s441_s11   ;;  %s598_s6 = smov %s425_s7 }
  0x4c   : > { %p14_p5 = scmp.ge.s32.totalorder %s17_s11, 4   ;;  %s599_s7 = smov %s429_s8 }
  0x4d   : > { %s600_s8 = smov %s513_s20  ;;  %s601_s9 = smov %s437_s10 }
  0x4e   : > { %s602_s10 = smov %s604_s14  ;;  %16 = sbr.rel (!%p14_p5) target bundleno = 6 (0x6), region = 70 }
  0x53   :  { %190 = vsyncpa [#allocation3], 1 }
  0x54   :  { %192 = vsyncpa [#allocation3 + $0x1], 1 }
  0x55   :  { %193 = vsyncpa [#allocation4], 1 }
  0x56   :  { %195 = vsyncpa [#allocation4 + $0x1], 1 }

</bundles_post_ra>
